<compile_context>
chip_gen: v6e
topology: v6e:2x2x1
jax: 0.10.0
libtpu: 0.0.40
codegen_flags: <defaults>
</compile_context>

<pallas_src>
import numpy as np

import jax
import jax.numpy as jnp
from jax.experimental import pallas as pl
from jax.experimental.pallas import tpu as pltpu

# ----------------------------- small config ---------------------------------------
B = 2            # batch
S = 8            # sequence length (X.shape[1])
D = 32           # embedding_size
MAX_LEN = 1000   # max_len of the PE table (as in the module)
DROPOUT = 0.1    # constructor arg; identity in eval mode
LANES = 128      # TPU lane width


# ----------------------------- PE table (host precompute, == __init__) ------------
def make_pe_table(max_len: int, d: int) -> np.ndarray:
    # Exactly mirrors the numpy construction in PositionalEncoding.__init__.
    P = np.zeros((1, max_len, d), dtype=np.float64)
    X = np.arange(0, max_len).reshape(-1, 1)
    Y = np.arange(0, d, 2) / d
    X = X / np.power(10000, Y)
    P[:, :, 0::2] = np.sin(X)
    P[:, :, 1::2] = np.cos(X)
    # torch.FloatTensor(...) -> float32
    return P.astype(np.float32)


_PE_TABLE_NP = make_pe_table(MAX_LEN, D)


# ----------------------------- Pallas kernel --------------------------------------
def _add_pe_kernel(x_ref, pe_ref, o_ref):
    # x_ref / pe_ref / o_ref: (rows, 128) f32, whole-slab VMEM-resident.
    # Output aliases the x input buffer (in-place elementwise add).
    # Dropout == identity in eval mode.
    o_ref[...] = x_ref[...] + pe_ref[...]


# ----------------------------- forward factory ------------------------------------
def make_positional_encoding_forward(batch: int, seq: int, d: int,
                                     pe_table_np: np.ndarray = _PE_TABLE_NP):
    """Builds forward(x) for fixed (batch, seq, d). x: (batch, seq, d) float32."""
    flat = batch * seq * d
    assert flat % LANES == 0, "batch*seq*d must be a multiple of 128 for this layout"
    rows = flat // LANES

    # Host precompute: slice table to seq, broadcast over batch, flatten to a
    # lane-dense (rows, 128) slab.  Closed over below -> compile-time constant;
    # only seq*d (x batch) floats ever reach the device, not the whole table.
    pe_slab_np = np.broadcast_to(
        pe_table_np[:, :seq, :], (batch, seq, d)
    ).reshape(rows, LANES).copy()
    pe_slab = jnp.asarray(pe_slab_np)

    call = pl.pallas_call(
        _add_pe_kernel,
        out_shape=jax.ShapeDtypeStruct((rows, LANES), jnp.float32),
        # No grid: single invocation, whole arrays resident in VMEM
        # (no double-buffer allocation, no pipeline prologue/epilogue).
        in_specs=[
            pl.BlockSpec(memory_space=pltpu.MemorySpace.VMEM),  # x slab
            pl.BlockSpec(memory_space=pltpu.MemorySpace.VMEM),  # pe slab (constant)
        ],
        out_specs=pl.BlockSpec(memory_space=pltpu.MemorySpace.VMEM),
        input_output_aliases={0: 0},  # write result over the x buffer
    )

    def forward(x: jnp.ndarray) -> jnp.ndarray:
        x_slab = x.reshape(rows, LANES)
        out_slab = call(x_slab, pe_slab)
        return out_slab.reshape(batch, seq, d)

    return forward


# ----------------------------- main -------------------------------------------------
if __name__ == "__main__":
    key = jax.random.PRNGKey(0)
    x = jax.random.normal(key, (B, S, D), dtype=jnp.float32)

    # Plain-JAX reference of the module's (eval-mode) forward, computed BEFORE the
    # donated call so x is still valid here.
    ref = x + jnp.asarray(_PE_TABLE_NP)[:, :S, :]
    ref = jax.block_until_ready(ref)

    forward = make_positional_encoding_forward(B, S, D)
    fwd = jax.jit(forward, donate_argnums=(0,))

    out = jax.block_until_ready(fwd(x))

    assert out.shape == (B, S, D), out.shape
    assert bool(jnp.all(jnp.isfinite(out)))
    assert bool(jnp.allclose(out, ref, atol=1e-6, rtol=1e-6))
    print("KERNEL_OK")
</pallas_src>

<mosaic_0001>
module attributes {stable_mosaic.version = 11 : i64} {
  func.func @_add_pe_kernel(%arg0: memref<4x128xf32, #tpu.memory_space<vmem>>, %arg1: memref<4x128xf32, #tpu.memory_space<vmem>>, %arg2: memref<4x128xf32, #tpu.memory_space<vmem>>) attributes {dimension_semantics = [], scalar_prefetch = 0 : i64, scratch_operands = 0 : i64, tpu.core_type = #tpu.core_type<tc>} {
    %c0 = arith.constant 0 : index
    %c0_0 = arith.constant 0 : index
    %0 = vector.load %arg0[%c0, %c0_0] : memref<4x128xf32, #tpu.memory_space<vmem>>, vector<4x128xf32>
    %c0_1 = arith.constant 0 : index
    %c0_2 = arith.constant 0 : index
    %1 = vector.load %arg1[%c0_1, %c0_2] : memref<4x128xf32, #tpu.memory_space<vmem>>, vector<4x128xf32>
    %2 = arith.addf %0, %1 : vector<4x128xf32>
    %c0_3 = arith.constant 0 : index
    %c0_4 = arith.constant 0 : index
    %3 = vector.load %arg2[%c0_3, %c0_4] : memref<4x128xf32, #tpu.memory_space<vmem>>, vector<4x128xf32>
    tpu.vector_store %arg2[%c0_3, %c0_4], %2 {strides = array<i32>} : memref<4x128xf32, #tpu.memory_space<vmem>>, vector<4x128xf32>,
    return
  }
}

</mosaic_0001>

<bundles_post_ra>
// kernel: forward.1
= control target key start
LH: loop header
LB: loop body
LE: loop exit
PB: predicated region body
PF: predicated region fallthrough
CT: control target
= control target key end

     0   :  { %s43_s0 = inlined_call_operand.vmem [shape: f32[4,128], index: 0, kind: input, shape index: {}, may-alias: {0,2}]   ;;  %s44_s1 = inlined_call_operand.vmem [shape: f32[4,128], index: 1, kind: input, shape index: {}]   ;;  %s45_s2 = inlined_call_operand.vmem [shape: f32[4,128], index: 2, kind: output, shape index: {}, may-alias: {0,2}]  }
   0x1   :  { %v11_v0 = vld [vmem:[%s43_s0] sm:$0xf] }
   0x2   :  { %v12_v1 = vld [vmem:[%s44_s1] sm:$0xf] }
   0x3   :  { %v13_v2 = vadd.f32 %v12_v1, %v11_v0 }
   0x5   :  { %14 = vst [vmem:[%s45_s2] sm:$0xf] %v13_v2 }

</bundles_post_ra>
